<compile_context>
chip_gen: v5e
topology: v5e:2x2
jax: 0.10.0
libtpu: 0.0.40
codegen_flags: <defaults>
</compile_context>

<pallas_src>
import functools

import jax
import jax.numpy as jnp
from jax.experimental import pallas as pl
from jax.experimental.pallas import tpu as pltpu


# Keep the fully-resident S copy when it is at most this many bytes
# (double-buffer-safe headroom inside the explicit VMEM limit below).
_S_RESIDENT_BYTES = 8 << 20
# Explicit scoped-VMEM limit: v5e's default is only 16 MiB; 40 MiB is safe on
# v5e/v6e (128 MiB physical) and v7x (64 MiB physical).
_VMEM_LIMIT_BYTES = 40 << 20


def _round_up(x, m):
    return ((x + m - 1) // m) * m


def _pad2(x, rows, cols):
    return jnp.pad(x, ((0, rows - x.shape[0]), (0, cols - x.shape[1])))


# ---------------------------------------------------------------------------
# Kernel 1: d^-1/2 of the self-loop-augmented graph.
#   dinv_i = rsqrt( sum_j A_ij + 1 )
# Streams the int8 adjacency with the same large tiles as the aggregation.
# ---------------------------------------------------------------------------
def _dinv_kernel(a_ref, o_ref, acc_ref):
    k = pl.program_id(1)

    @pl.when(k == 0)
    def _():
        acc_ref[...] = jnp.zeros_like(acc_ref)

    acc_ref[...] += jnp.sum(a_ref[...].astype(jnp.float32), axis=1, keepdims=True)

    @pl.when(k == pl.num_programs(1) - 1)
    def _():
        # +1.0 accounts for the self loop added analytically.
        o_ref[...] = jax.lax.rsqrt(acc_ref[...] + 1.0)


def compute_dinv(adj_p, tm, tk):
    n_p = adj_p.shape[0]
    return pl.pallas_call(
        _dinv_kernel,
        out_shape=jax.ShapeDtypeStruct((n_p, 1), jnp.float32),
        grid_spec=pltpu.PrefetchScalarGridSpec(
            num_scalar_prefetch=0,
            grid=(n_p // tm, n_p // tk),
            in_specs=[pl.BlockSpec((tm, tk), lambda i, k: (i, k))],
            out_specs=pl.BlockSpec((tm, 1), lambda i, k: (i, 0)),
            scratch_shapes=[pltpu.VMEM((tm, 1), jnp.float32)],
        ),
        compiler_params=pltpu.CompilerParams(
            dimension_semantics=("parallel", "arbitrary"),
            vmem_limit_bytes=_VMEM_LIMIT_BYTES),
    )(adj_p)


# ---------------------------------------------------------------------------
# Kernel 2: per-layer feature transform,  S = dinv ⊙ (X @ W)  (bf16 output).
# bf16 x bf16 -> f32 on the MXU; row-tiled, W stays a single resident block.
# ---------------------------------------------------------------------------
def _transform_kernel(x_ref, w_ref, dinv_ref, o_ref):
    xw = jnp.dot(x_ref[...], w_ref[...],
                 preferred_element_type=jnp.float32)          # (TM, Hp) f32
    o_ref[...] = (xw * dinv_ref[...]).astype(o_ref.dtype)


def feature_transform(x, w, dinv, tm):
    n_p, f = x.shape
    hp = w.shape[1]
    return pl.pallas_call(
        _transform_kernel,
        out_shape=jax.ShapeDtypeStruct((n_p, hp), jnp.bfloat16),
        grid_spec=pltpu.PrefetchScalarGridSpec(
            num_scalar_prefetch=0,
            grid=(n_p // tm,),
            in_specs=[
                pl.BlockSpec((tm, f), lambda i: (i, 0)),
                pl.BlockSpec((f, hp), lambda i: (0, 0)),
                pl.BlockSpec((tm, 1), lambda i: (i, 0)),
            ],
            out_specs=pl.BlockSpec((tm, hp), lambda i: (i, 0)),
        ),
        compiler_params=pltpu.CompilerParams(
            dimension_semantics=("parallel",)),
    )(x, w, dinv)


# ---------------------------------------------------------------------------
# Kernel 3: tiled neighborhood aggregation (the O(N^2) matmul).
#   out = dinv ⊙ ( A @ S + S ) + b      [+ ReLU for layer 1]
# A tile: (TM, TK) int8 widened in-kernel to bf16; f32 accumulator.
# Two variants: S fully resident in VMEM (sliced in-kernel) or streamed
# k-tiles when S is too large.
# ---------------------------------------------------------------------------
def _aggregate_resident_kernel(a_ref, s_ref, dinv_ref, b_ref, o_ref,
                               acc_ref, *, apply_relu, tm, tk):
    i = pl.program_id(0)
    k = pl.program_id(1)

    @pl.when(k == 0)
    def _():
        # Self-loop contribution I @ S for this row tile (from resident S).
        row0 = pl.multiple_of(i * tm, tm)
        acc_ref[...] = s_ref[pl.ds(row0, tm), :].astype(jnp.float32)

    col0 = pl.multiple_of(k * tk, tk)
    acc_ref[...] += jnp.dot(a_ref[...].astype(jnp.bfloat16),
                            s_ref[pl.ds(col0, tk), :],
                            preferred_element_type=jnp.float32)

    @pl.when(k == pl.num_programs(1) - 1)
    def _():
        out = acc_ref[...] * dinv_ref[...] + b_ref[...]
        if apply_relu:
            out = jnp.maximum(out, 0.0)
        o_ref[...] = out.astype(o_ref.dtype)


def _aggregate_stream_kernel(a_ref, s_k_ref, s_self_ref, dinv_ref, b_ref,
                             o_ref, acc_ref, *, apply_relu):
    k = pl.program_id(1)

    @pl.when(k == 0)
    def _():
        acc_ref[...] = s_self_ref[...].astype(jnp.float32)

    acc_ref[...] += jnp.dot(a_ref[...].astype(jnp.bfloat16), s_k_ref[...],
                            preferred_element_type=jnp.float32)

    @pl.when(k == pl.num_programs(1) - 1)
    def _():
        out = acc_ref[...] * dinv_ref[...] + b_ref[...]
        if apply_relu:
            out = jnp.maximum(out, 0.0)
        o_ref[...] = out.astype(o_ref.dtype)


def aggregate(adj_p, s, dinv, bias, tm, tk, *, apply_relu, out_dtype):
    n_p, hp = s.shape
    s_resident = (n_p * hp * 2) <= _S_RESIDENT_BYTES

    if s_resident:
        kernel = functools.partial(_aggregate_resident_kernel,
                                   apply_relu=apply_relu, tm=tm, tk=tk)
        in_specs = [
            pl.BlockSpec((tm, tk), lambda i, k: (i, k)),      # A tile (int8)
            pl.BlockSpec((n_p, hp), lambda i, k: (0, 0)),     # S, fully resident
            pl.BlockSpec((tm, 1), lambda i, k: (i, 0)),       # dinv rows
            pl.BlockSpec((1, hp), lambda i, k: (0, 0)),       # bias
        ]
        args = (adj_p, s, dinv, bias)
    else:
        kernel = functools.partial(_aggregate_stream_kernel,
                                   apply_relu=apply_relu)
        in_specs = [
            pl.BlockSpec((tm, tk), lambda i, k: (i, k)),      # A tile (int8)
            pl.BlockSpec((tk, hp), lambda i, k: (k, 0)),      # S k-tile
            pl.BlockSpec((tm, hp), lambda i, k: (i, 0)),      # S self tile
            pl.BlockSpec((tm, 1), lambda i, k: (i, 0)),       # dinv rows
            pl.BlockSpec((1, hp), lambda i, k: (0, 0)),       # bias
        ]
        args = (adj_p, s, s, dinv, bias)

    return pl.pallas_call(
        kernel,
        out_shape=jax.ShapeDtypeStruct((n_p, hp), out_dtype),
        grid_spec=pltpu.PrefetchScalarGridSpec(
            num_scalar_prefetch=0,
            grid=(n_p // tm, n_p // tk),
            in_specs=in_specs,
            out_specs=pl.BlockSpec((tm, hp), lambda i, k: (i, 0)),
            scratch_shapes=[pltpu.VMEM((tm, hp), jnp.float32)],
        ),
        compiler_params=pltpu.CompilerParams(
            dimension_semantics=("parallel", "arbitrary"),
            vmem_limit_bytes=_VMEM_LIMIT_BYTES),
    )(*args)


# ---------------------------------------------------------------------------
# Model wrapper (padding / slicing glue in plain JAX only).
# ---------------------------------------------------------------------------
def gcn_forward(adj, features, params):
    """adj: dense [N, N] 0/1 adjacency with zero diagonal; features: [N, in_feats]."""
    n, f = features.shape
    n_hidden = params["w1"].shape[1]
    n_classes = params["w2"].shape[1]

    # Tile selection: large tiles on the N^2 streaming kernels (per-step
    # overhead amortization); small graphs get a single full-extent tile.
    if n > 1024:
        tk = 1024
        tm = 512
        n_p = _round_up(n, tk)
    else:
        n_p = _round_up(n, 8)
        tm = tk = n_p

    fp = _round_up(f, 128)           # lane-dense input-feature width
    hp1 = _round_up(n_hidden, 128)   # lane-dense hidden width
    cp = _round_up(n_classes, 128)   # lane-dense class width

    # int8 0/1 adjacency; cast BEFORE padding so no padded f32 N^2 temporary
    # is ever materialized.  Padded rows/cols are zero.
    adj_p = _pad2(adj.astype(jnp.int8), n_p, n_p)
    x_p = _pad2(features, n_p, fp).astype(jnp.bfloat16)

    w1 = _pad2(params["w1"], fp, hp1).astype(jnp.bfloat16)
    b1 = _pad2(params["b1"].reshape(1, -1), 1, hp1)
    w2 = _pad2(params["w2"], hp1, cp).astype(jnp.bfloat16)
    b2 = _pad2(params["b2"].reshape(1, -1), 1, cp)

    dinv = compute_dinv(adj_p, tm, tk)                         # (Np, 1) f32

    # Layer 1: GraphConv + ReLU, inter-layer activation kept in bf16.
    s1 = feature_transform(x_p, w1, dinv, tm)                  # (Np, Hp1) bf16
    h = aggregate(adj_p, s1, dinv, b1, tm, tk,
                  apply_relu=True, out_dtype=jnp.bfloat16)

    # TODO(synk): nn.Dropout(p=0.5) is identity in eval mode; training-mode
    # random masking is intentionally not applied here.

    # Layer 2: GraphConv (no activation), f32 logits.
    s2 = feature_transform(h, w2, dinv, tm)                    # (Np, Cp) bf16
    out = aggregate(adj_p, s2, dinv, b2, tm, tk,
                    apply_relu=False, out_dtype=jnp.float32)

    return out[:n, :n_classes]


def init_params(key, in_feats, n_hidden, n_classes):
    k1, k2 = jax.random.split(key, 2)

    def xavier(k, fan_in, fan_out):
        limit = (6.0 / (fan_in + fan_out)) ** 0.5
        return jax.random.uniform(k, (fan_in, fan_out), jnp.float32, -limit, limit)

    return {
        "w1": xavier(k1, in_feats, n_hidden),
        "b1": jnp.zeros((n_hidden,), jnp.float32),
        "w2": xavier(k2, n_hidden, n_classes),
        "b2": jnp.zeros((n_classes,), jnp.float32),
    }


if __name__ == "__main__":
    N_NODES, IN_FEATS, N_HIDDEN, N_CLASSES = 8, 16, 32, 4

    key = jax.random.PRNGKey(0)
    k_adj, k_feat, k_param = jax.random.split(key, 3)

    # Deterministic small random symmetric graph (zero diagonal) + features.
    adj = (jax.random.uniform(k_adj, (N_NODES, N_NODES)) < 0.3).astype(jnp.float32)
    adj = jnp.maximum(adj, adj.T)
    adj = adj * (1.0 - jnp.eye(N_NODES, dtype=jnp.float32))   # no self loops in input
    features = jax.random.normal(k_feat, (N_NODES, IN_FEATS), jnp.float32)

    params = init_params(k_param, IN_FEATS, N_HIDDEN, N_CLASSES)

    out = gcn_forward(adj, features, params)
    jax.block_until_ready(out)
    assert out.shape == (N_NODES, N_CLASSES)
    assert bool(jnp.all(jnp.isfinite(out)))
    print("KERNEL_OK")
</pallas_src>

<mosaic_0001>
module attributes {stable_mosaic.version = 11 : i64} {
  func.func @_dinv_kernel(%arg0: i32, %arg1: i32, %arg2: memref<8x8xi8, #tpu.memory_space<vmem>>, %arg3: memref<8x1xf32, #tpu.memory_space<vmem>>, %arg4: memref<8x1xf32, #tpu.memory_space<vmem>>) attributes {dimension_semantics = [#tpu.dimension_semantics<parallel>, #tpu.dimension_semantics<arbitrary>], iteration_bounds = array<i64: 1, 1>, scalar_prefetch = 0 : i64, scratch_operands = 1 : i64, tpu.core_type = #tpu.core_type<tc>, window_params = [{transform_indices = @transform_0, window_bounds = array<i64: 8, 8>}, {transform_indices = @transform_1, window_bounds = array<i64: 8, 1>}]} {
    %c0_i32 = arith.constant 0 : i32
    %0 = arith.cmpi eq, %arg1, %c0_i32 : i32
    %1 = arith.extui %0 : i1 to i32
    %c0_i32_0 = arith.constant 0 : i32
    %2 = arith.cmpi ne, %1, %c0_i32_0 : i32
    scf.if %2 {
      %cst_8 = arith.constant 0.000000e+00 : f32
      %13 = vector.broadcast %cst_8 : f32 to vector<8x1xf32>
      %c0_9 = arith.constant 0 : index
      %c0_10 = arith.constant 0 : index
      %14 = vector.load %arg4[%c0_9, %c0_10] : memref<8x1xf32, #tpu.memory_space<vmem>>, vector<8x1xf32>
      tpu.vector_store %arg4[%c0_9, %c0_10], %13 {strides = array<i32>} : memref<8x1xf32, #tpu.memory_space<vmem>>, vector<8x1xf32>,
    } else {
    }
    %c0 = arith.constant 0 : index
    %c0_1 = arith.constant 0 : index
    %3 = vector.load %arg4[%c0, %c0_1] : memref<8x1xf32, #tpu.memory_space<vmem>>, vector<8x1xf32>
    %c0_2 = arith.constant 0 : index
    %c0_3 = arith.constant 0 : index
    %4 = vector.load %arg2[%c0_2, %c0_3] : memref<8x8xi8, #tpu.memory_space<vmem>>, vector<8x8xi8>
    %5 = arith.sitofp %4 : vector<8x8xi8> to vector<8x8xf32>
    %cst = arith.constant dense<0.000000e+00> : vector<8xf32>
    %6 = vector.multi_reduction <add>, %5, %cst [1] : vector<8x8xf32> to vector<8xf32>
    %7 = vector.shape_cast %6 : vector<8xf32> to vector<8x1xf32>
    %8 = arith.addf %3, %7 : vector<8x1xf32>
    %c0_4 = arith.constant 0 : index
    %c0_5 = arith.constant 0 : index
    %9 = vector.load %arg4[%c0_4, %c0_5] : memref<8x1xf32, #tpu.memory_space<vmem>>, vector<8x1xf32>
    tpu.vector_store %arg4[%c0_4, %c0_5], %8 {strides = array<i32>} : memref<8x1xf32, #tpu.memory_space<vmem>>, vector<8x1xf32>,
    %c0_i32_6 = arith.constant 0 : i32
    %10 = arith.cmpi eq, %arg1, %c0_i32_6 : i32
    %11 = arith.extui %10 : i1 to i32
    %c0_i32_7 = arith.constant 0 : i32
    %12 = arith.cmpi ne, %11, %c0_i32_7 : i32
    scf.if %12 {
      %c0_8 = arith.constant 0 : index
      %c0_9 = arith.constant 0 : index
      %13 = vector.load %arg4[%c0_8, %c0_9] : memref<8x1xf32, #tpu.memory_space<vmem>>, vector<8x1xf32>
      %cst_10 = arith.constant 1.000000e+00 : f32
      %14 = vector.broadcast %cst_10 : f32 to vector<8x1xf32>
      %15 = arith.addf %13, %14 : vector<8x1xf32>
      %16 = math.rsqrt %15 : vector<8x1xf32>
      %c0_11 = arith.constant 0 : index
      %c0_12 = arith.constant 0 : index
      %17 = vector.load %arg3[%c0_11, %c0_12] : memref<8x1xf32, #tpu.memory_space<vmem>>, vector<8x1xf32>
      tpu.vector_store %arg3[%c0_11, %c0_12], %16 {strides = array<i32>} : memref<8x1xf32, #tpu.memory_space<vmem>>, vector<8x1xf32>,
    } else {
    }
    return
  }
  func.func @transform_0(%arg0: i32, %arg1: i32) -> (i32, i32) {
    %c0_i32 = arith.constant 0 : i32
    return %arg0, %arg1 : i32, i32
  }
  func.func @transform_1(%arg0: i32, %arg1: i32) -> (i32, i32) {
    %c0_i32 = arith.constant 0 : i32
    %c0_i32_0 = arith.constant 0 : i32
    return %arg0, %c0_i32 : i32, i32
  }
}

</mosaic_0001>

<bundles_post_ra>
// kernel: tpu_custom_call.1
= control target key start
LH: loop header
LB: loop body
LE: loop exit
PB: predicated region body
PF: predicated region fallthrough
CT: control target
= control target key end

     0   :  { %6 = vsyncpa [#allocation4], 0  ;;  %s90_s9 = smov [#allocation3]   ;;  %s111_s0 = inlined_call_operand.hbm [shape: s8[8,8], index: 0, kind: input, shape index: {}]   ;;  %s112_s1 = inlined_call_operand.vmem [shape: f32[8,1], index: 1, kind: output, shape index: {}]  }
   0x1   :  { %s12_s8 = sshll.u32 %s111_s0, 4  ;;  %s14_s10 = sshll.u32 %s90_s9, 4  ;;  %s13_s8 = int_to_ptr.hbm [resolvable:$true] %s12_s8  ;;  %s15_s10 = int_to_ptr.vmem [resolvable:$true] %s14_s10 }
   0x2   :  { %17 = dma.hbm_to_vmem [thread:$0]  %s13_s8, 32, %s15_s10, [#allocation4]  }
   0x3   :  { %88 = dma.done.wait [#allocation4], 32  }
   0x4   :  { %89 = vsyncadd [#allocation4], 4294967264  ;;  %vm26_vm0 = vcmask 7168   ;;  %v91_v0 = vmov 0.0   ;;  %v29_v1 = vld [vmem:[#allocation3] sm:$0x3] }
   0x5   :  { %27 = vst.msk [vmem:[#allocation2] sm:$0xff] %vm26_vm0, %v91_v0  ;;  %v30_v2 = vunpack.c.0.s8 %v29_v1  ;;  %vm32_vm1 = vcmask 64512  }
   0x7   :  { %v31_v3 = vcvt.s32.f32 %v30_v2 }
   0x9   :  { %v33_v4 = vsel %vm32_vm1, %v31_v3, 0.0 }
   0xa   :  { %34 = vadd.xlane.f32.xlu0 %v33_v4 }
   0xc   :  { %v28_v5 = vld [vmem:[#allocation2] sm:$0xff] }
  0x7d   :  { %v35_v6 = vpop.xlane.xlu0 %34 }
  0x7e   :  { %v36_v7 = vadd.f32 %v35_v6, %v28_v5 }
  0x80   :  { %38 = vst.msk [vmem:[#allocation2] sm:$0xff] %vm26_vm0, %v36_v7 }
  0x87   :  { %v42_v8 = vld [vmem:[#allocation2] sm:$0xff] }
  0x88   :  { %v43_v9 = vadd.f32 1.0, %v42_v8 }
  0x8a   :  { %62 = vrsqrt.f32 %v43_v9  ;;  %vm50_vm3 = vweird.f32 %v43_v9 }
  0x90   :  { %v63_v10 = vpop.eup %62 }
  0x91   :  { %v45_v11 = vmul.f32 %v63_v10, %v43_v9  ;;  %vm51_vm2 = vweird.f32 %v63_v10 }
  0x92   :  { %vm52_vm4 = vmor %vm50_vm3, %vm51_vm2 }
  0x93   :  { %v46_v12 = vmul.f32 %v63_v10, %v45_v11 }
  0x95   :  { %v47_v13 = vmul.f32 0.5, %v46_v12 }
  0x97   :  { %v48_v14 = vsub.f32 1.5, %v47_v13 }
  0x99   :  { %v49_v15 = vmul.f32 %v63_v10, %v48_v14 }
  0x9b   :  { %v53_v16 = vsel %vm52_vm4, %v63_v10, %v49_v15 }
  0x9c   :  { %54 = vst.msk [vmem:[%s112_s1] sm:$0xff] %vm26_vm0, %v53_v16 }
  0x9d   :  { %59 = vsyncpa [#allocation4], 1 }

</bundles_post_ra>
